<compile_context>
chip_gen: v7x
topology: tpu7x:2x2x1
jax: 0.10.0
libtpu: 0.0.40
codegen_flags: <defaults>
</compile_context>

<pallas_src>
import functools

import jax
import jax.numpy as jnp
from jax.experimental import pallas as pl
from jax.experimental.pallas import tpu as pltpu

THRESHOLD = -25.0            # matches Act(threshold=-25)
LANE = 128                   # TPU lane width
TARGET_BLOCK_BYTES = 2 << 20 # ~2 MiB blocks: 4 pipelined buffers fit every gen


def _clamp(x, clamp_max):
    """PyTorch-equivalent clamp: x if x < clamp_max else clamp_max (NaN -> clamp)."""
    c = jnp.asarray(clamp_max, dtype=x.dtype)
    return jnp.where(x < c, x, c)


# ----------------------------------------------------------------------------
# Kernels
# ----------------------------------------------------------------------------
def _act_lane_dense_pow2_kernel(x_ref, o_ref, *, clamp_max, c):
    """Lane-dense [rows, 128] view, 128 % c == 0: mask depends only on the lane."""
    x = x_ref[...]
    clipped = _clamp(x, clamp_max)
    if c == 1:
        o_ref[...] = clipped
    else:
        lane = jax.lax.broadcasted_iota(jnp.int32, x.shape, 1)
        mask = (lane & (c - 1)) == (c - 1)   # single compare per vreg
        o_ref[...] = jnp.where(mask, clipped, x)


def _act_lane_dense_general_kernel(x_ref, o_ref, *, clamp_max, c, block_rows):
    """Lane-dense view for c <= 128 that does not divide 128 (rare)."""
    x = x_ref[...]
    lanes = x.shape[1]
    row = (jax.lax.broadcasted_iota(jnp.int32, x.shape, 0)
           + pl.program_id(0) * block_rows)
    lane = jax.lax.broadcasted_iota(jnp.int32, x.shape, 1)
    # (row*128 + lane) % c, overflow-safe small-int modular arithmetic.
    rem = ((row % c) * (lanes % c) + lane) % c
    o_ref[...] = jnp.where(rem == c - 1, _clamp(x, clamp_max), x)


def _act_last_slab_kernel(x_ref, o_ref, *, clamp_max):
    """Wide-C aliased path: block is the last 128-lane slab; clamp lane 127."""
    x = x_ref[...]
    lane = jax.lax.broadcasted_iota(jnp.int32, x.shape, 1)
    o_ref[...] = jnp.where(lane == x.shape[1] - 1, _clamp(x, clamp_max), x)


def _act_colblock_kernel(x_ref, o_ref, *, clamp_max, c, block_cols):
    """General row+column tiled fallback: clamp only global column c-1."""
    x = x_ref[...]
    col = (jax.lax.broadcasted_iota(jnp.int32, x.shape, 1)
           + pl.program_id(1) * block_cols)
    o_ref[...] = jnp.where(col == c - 1, _clamp(x, clamp_max), x)


# ----------------------------------------------------------------------------
# Wrapper
# ----------------------------------------------------------------------------
def _pick_block_rows(total_rows, row_bytes, sub_mult):
    """Row-tile size targeting ~TARGET_BLOCK_BYTES blocks, >=2 grid steps when useful."""
    if total_rows <= sub_mult:
        return total_rows
    target_rows = max(sub_mult, TARGET_BLOCK_BYTES // max(row_bytes, 1))
    br = min(total_rows, target_rows)
    # Keep at least 2 grid steps so v7x's two TensorCores both get work, as
    # long as halving still leaves >= ~64 KiB blocks to amortize step overhead.
    if br >= total_rows and total_rows * row_bytes >= (128 << 10):
        br = -(-total_rows // 2)
    return max(sub_mult, (br // sub_mult) * sub_mult)


def act(x: jax.Array, threshold: float = THRESHOLD) -> jax.Array:
    """Pallas equivalent of Act(threshold).forward(x) for 2-D x of shape [N, C]."""
    assert x.ndim == 2, "Act kernel implemented for 2-D [N, C] inputs"
    n, c = x.shape
    clamp_max = -threshold
    itemsize = jnp.dtype(x.dtype).itemsize
    sub_mult = 8 if itemsize >= 4 else (16 if itemsize == 2 else 32)

    # ---- Path 1: wide C -> only DMA the last 128-lane slab, alias the rest --
    if c >= 2 * LANE and c % LANE == 0:
        br = _pick_block_rows(n, LANE * itemsize, sub_mult)
        last_blk = c // LANE - 1
        kernel = functools.partial(_act_last_slab_kernel, clamp_max=clamp_max)
        cost = pl.CostEstimate(flops=n * LANE, transcendentals=0,
                               bytes_accessed=2 * n * LANE * itemsize)
        return pl.pallas_call(
            kernel,
            out_shape=jax.ShapeDtypeStruct((n, c), x.dtype),
            grid=(pl.cdiv(n, br),),
            in_specs=[pl.BlockSpec((br, LANE), lambda i: (i, last_blk))],
            out_specs=pl.BlockSpec((br, LANE), lambda i: (i, last_blk)),
            input_output_aliases={0: 0},
            compiler_params=pltpu.CompilerParams(
                dimension_semantics=("parallel",)),
            cost_estimate=cost,
        )(x)

    cost = pl.CostEstimate(flops=n * c, transcendentals=0,
                           bytes_accessed=2 * n * c * itemsize)

    # ---- Path 2: lane-dense reshape for small C ------------------------------
    if c <= LANE and (n * c) % LANE == 0:
        r = (n * c) // LANE
        br = _pick_block_rows(r, LANE * itemsize, sub_mult)
        if LANE % c == 0:
            kernel = functools.partial(_act_lane_dense_pow2_kernel,
                                       clamp_max=clamp_max, c=c)
        else:
            kernel = functools.partial(_act_lane_dense_general_kernel,
                                       clamp_max=clamp_max, c=c, block_rows=br)
        out = pl.pallas_call(
            kernel,
            out_shape=jax.ShapeDtypeStruct((r, LANE), x.dtype),
            grid=(pl.cdiv(r, br),),
            in_specs=[pl.BlockSpec((br, LANE), lambda i: (i, 0))],
            out_specs=pl.BlockSpec((br, LANE), lambda i: (i, 0)),
            compiler_params=pltpu.CompilerParams(
                dimension_semantics=("parallel",)),
            cost_estimate=cost,
        )(x.reshape(r, LANE))
        return out.reshape(n, c)

    # ---- Path 3: general row/column tiled fallback (VMEM-budgeted) ----------
    row_bytes = c * itemsize
    if c <= LANE or row_bytes * sub_mult <= TARGET_BLOCK_BYTES:
        bc = c
    else:
        bc = max(LANE, (TARGET_BLOCK_BYTES // (sub_mult * itemsize)) // LANE * LANE)
        bc = min(bc, pl.cdiv(c, LANE) * LANE)
    br = _pick_block_rows(n, bc * itemsize, sub_mult)
    kernel = functools.partial(_act_colblock_kernel, clamp_max=clamp_max,
                               c=c, block_cols=bc)
    return pl.pallas_call(
        kernel,
        out_shape=jax.ShapeDtypeStruct((n, c), x.dtype),
        grid=(pl.cdiv(n, br), pl.cdiv(c, bc)),
        in_specs=[pl.BlockSpec((br, bc), lambda i, j: (i, j))],
        out_specs=pl.BlockSpec((br, bc), lambda i, j: (i, j)),
        compiler_params=pltpu.CompilerParams(
            dimension_semantics=("parallel", "parallel")),
        cost_estimate=cost,
    )(x)


def _act_ref(x: jax.Array, threshold: float = THRESHOLD) -> jax.Array:
    """Pure-JAX reference mirroring the PyTorch module."""
    clamp_max = -threshold
    if x.shape[1] > 1:
        last = _clamp(x[:, -1], clamp_max)[:, None]
        return jnp.concatenate([x[:, :-1], last], axis=1)
    return _clamp(x, clamp_max)


if __name__ == "__main__":
    key = jax.random.PRNGKey(0)
    keys = jax.random.split(key, 6)

    cases = [
        ("lane-dense pow2 (256,4)",        (256, 4)),
        ("lane-dense c==1 (128,1)",        (128, 1)),
        ("lane-dense general c=3 (128,3)", (128, 3)),
        ("wide-C aliased slab (16,256)",   (16, 256)),
        ("fallback small (8,4)",           (8, 4)),
        ("fallback c==1 (8,1)",            (8, 1)),
    ]
    for k, (name, shape) in zip(keys, cases):
        x = jax.random.normal(k, shape, dtype=jnp.float32) * 30.0
        out = jax.block_until_ready(act(x))
        ref = _act_ref(x)
        assert out.shape == x.shape and out.dtype == x.dtype, name
        assert jnp.allclose(out, ref), f"mismatch vs reference: {name}"

    print("KERNEL_OK")
</pallas_src>

<mosaic_0001>
module attributes {stable_mosaic.version = 11 : i64} {
  func.func @_act_lane_dense_pow2_kernel(%arg0: i32, %arg1: memref<8x128xf32, #tpu.memory_space<vmem>>, %arg2: memref<8x128xf32, #tpu.memory_space<vmem>>) attributes {dimension_semantics = [#tpu.dimension_semantics<parallel>], iteration_bounds = array<i64: 1>, scalar_prefetch = 0 : i64, scratch_operands = 0 : i64, tpu.core_type = #tpu.core_type<tc>, window_params = [{transform_indices = @transform_0, window_bounds = array<i64: 8, 128>}, {transform_indices = @transform_1, window_bounds = array<i64: 8, 128>}]} {
    %c0 = arith.constant 0 : index
    %c0_0 = arith.constant 0 : index
    %0 = vector.load %arg1[%c0, %c0_0] : memref<8x128xf32, #tpu.memory_space<vmem>>, vector<8x128xf32>
    %cst = arith.constant 2.500000e+01 : f32
    %1 = vector.broadcast %cst : f32 to vector<8x128xf32>
    %2 = arith.cmpf olt, %0, %1 : vector<8x128xf32>
    %cst_1 = arith.constant 2.500000e+01 : f32
    %3 = vector.broadcast %cst_1 : f32 to vector<8x128xf32>
    %4 = arith.select %2, %0, %3 : vector<8x128xi1>, vector<8x128xf32>
    %5 = tpu.iota {dimensions = array<i32: 1>} : vector<8x128xi32>
    %c3_i32 = arith.constant 3 : i32
    %6 = vector.broadcast %c3_i32 : i32 to vector<8x128xi32>
    %7 = arith.andi %5, %6 : vector<8x128xi32>
    %c3_i32_2 = arith.constant 3 : i32
    %8 = vector.broadcast %c3_i32_2 : i32 to vector<8x128xi32>
    %9 = arith.cmpi eq, %7, %8 : vector<8x128xi32>
    %10 = arith.select %9, %4, %0 : vector<8x128xi1>, vector<8x128xf32>
    %c0_3 = arith.constant 0 : index
    %c0_4 = arith.constant 0 : index
    %11 = vector.load %arg2[%c0_3, %c0_4] : memref<8x128xf32, #tpu.memory_space<vmem>>, vector<8x128xf32>
    tpu.vector_store %arg2[%c0_3, %c0_4], %10 {strides = array<i32>} : memref<8x128xf32, #tpu.memory_space<vmem>>, vector<8x128xf32>,
    return
  }
  func.func @transform_0(%arg0: i32) -> (i32, i32) {
    %c0_i32 = arith.constant 0 : i32
    %c0_i32_0 = arith.constant 0 : i32
    return %arg0, %c0_i32 : i32, i32
  }
  func.func @transform_1(%arg0: i32) -> (i32, i32) {
    %c0_i32 = arith.constant 0 : i32
    %c0_i32_0 = arith.constant 0 : i32
    return %arg0, %c0_i32 : i32, i32
  }
}

</mosaic_0001>

<bundles_post_ra>
// kernel: tpu_custom_call.1
= control target key start
LH: loop header
LB: loop body
LE: loop exit
PB: predicated region body
PF: predicated region fallthrough
CT: control target
= control target key end

     0   :  { %6 = vsyncpa [#allocation3], 0  ;;  %s131_s0 = inlined_call_operand.hbm [shape: f32[8,128], index: 0, kind: input, shape index: {}]   ;;  %s132_s1 = inlined_call_operand.hbm [shape: f32[8,128], index: 1, kind: output, shape index: {}]  }
   0x1   :  { %7 = vsyncpa [#allocation4], 0  ;;  %s95_s6 = smov [#allocation2]   ;;  %s47_s10 = scalar_lea.hbm %s131_s0, 128 }
   0x2   :  { %s14_s7 = sshll.u32 %s95_s6, 4  ;;  %p48_p0 = scmp.ne.s32.totalorder %s131_s0, %s47_s10  ;;  %s15_s7 = int_to_ptr.vmem [resolvable:$true] %s14_s7 }
   0x3   :  { %p51_p1 = scmp.lt.u32.totalorder %s47_s10, %s131_s0 }
   0x5   :  { %p53_p2 = pnand %p51_p1, %p48_p0 }
   0x7   :  { %56 = shalt.err (!%p53_p2)
}
   0x8   :  { %s57_s15 = scalar_lea.vmem %s15_s7, 128  ;;  %p62_p4 = scmp.lt.s32.totalorder %s15_s7, %s15_s7 }
   0x9   :  { %p58_p3 = scmp.ne.s32.totalorder %s15_s7, %s57_s15  ;;  %p63_p5 = scmp.lt.s32.totalorder %s57_s15, %s57_s15 }
   0xb   :  { %p64_p6 = por %p63_p5, %p62_p4 }
   0xd   :  { %p65_p7 = pnand %p64_p6, %p58_p3 }
   0xf   :  { %68 = shalt.err (!%p65_p7)
}
  0x10   :  { %17 = dma.hbm_to_vmem [thread:$0]  %s131_s0, 128, %s15_s7, [#allocation3]  }
  0x11   :  { %91 = dma.done.wait [#allocation3], 128  }
  0x12   :  { %92 = vsyncadd [#allocation3], 4294967168  ;;  %v24_v0 = vlaneseq  ;;  %s96_s18 = smov [#allocation5]   ;;  %v21_v3 = vld [vmem:[#allocation2] sm:$0xff] }
  0x13   :  { %s36_s19 = sshll.u32 %s96_s18, 4  ;;  %vm22_vm1 = vcmp.lt.f32.partialorder %v21_v3, 25.0  ;;  %s37_s19 = int_to_ptr.vmem [resolvable:$true] %s36_s19 }
  0x14   :  { %v25_v1 = vand.u32 127, %v24_v0  ;;  %v23_v4 = vsel %vm22_vm1, %v21_v3, 25.0  ;;  %s69_s20 = scalar_lea.vmem %s37_s19, 128  ;;  %p74_p9 = scmp.lt.s32.totalorder %s37_s19, %s37_s19 }
  0x15   :  { %p70_p8 = scmp.ne.s32.totalorder %s37_s19, %s69_s20  ;;  %p75_p10 = scmp.lt.s32.totalorder %s69_s20, %s69_s20 }
  0x16   :  { %v26_v2 = vand.u32 3, %v25_v1 }
  0x17   :  { %p76_p11 = por %p75_p10, %p74_p9 }
  0x18   :  { %vm27_vm0 = vcmp.eq.s32.totalorder %v26_v2, 3 }
  0x19   :  { %v28_v5 = vsel %vm27_vm0, %v23_v4, %v21_v3  ;;  %p77_p12 = pnand %p76_p11, %p70_p8 }
  0x1a   :  { %29 = vst [vmem:[#allocation5] sm:$0xff] %v28_v5 }
  0x1b   :  { %80 = shalt.err (!%p77_p12)
}
  0x1c   :  { %s81_s22 = scalar_lea.hbm %s132_s1, 128 }
  0x1d   :  { %p82_p13 = scmp.ne.s32.totalorder %s132_s1, %s81_s22  ;;  %p85_p0 = scmp.lt.u32.totalorder %s81_s22, %s132_s1 }
  0x1f   :  { %p87_p1 = pnand %p85_p0, %p82_p13 }
  0x21   :  { %90 = shalt.err (!%p87_p1)
}
  0x22   :  { %39 = dma.vmem_to_hbm [thread:$0]  %s37_s19, 128, %s132_s1, [#allocation4]  }
  0x23   :  { %93 = dma.done.wait [#allocation4], 128  }
  0x24   :  { %94 = vsyncadd [#allocation4], 4294967168 }
  0x25   :  { %43 = vsyncpa [#allocation3], 1 }
  0x26   :  { %44 = vsyncpa [#allocation4], 1 }

</bundles_post_ra>
